<compile_context>
chip_gen: v6e
topology: v6e:2x2x1
jax: 0.10.0
libtpu: 0.0.40
codegen_flags: <defaults>
</compile_context>

<pallas_src>
import jax
import jax.numpy as jnp
from jax.experimental import pallas as pl
from jax.experimental.pallas import tpu as pltpu

_LANES = 128
_SUBLANES = 8


def _conv_fma_kernel(w_ref, b_ref, p_ref, o_ref):
    # w_ref: (OC*K,)     f32 SMEM -- flattened OIHW weights, k = c*KH*KW + kh*KW + kw
    # b_ref: (OC,)       f32 SMEM -- bias
    # p_ref: (K, S, 128) f32 VMEM -- im2col patches, S*128 = padded B*HO*WO
    # o_ref: (OC, S, 128) f32 VMEM -- lane/sublane-dense output slab
    K, S, L = p_ref.shape
    OC = o_ref.shape[0]

    # Start each output slab at its bias value (scalar from SMEM, broadcast once).
    accs = [jnp.full((S, L), b_ref[oc], dtype=jnp.float32) for oc in range(OC)]

    # K aligned full-tile loads, OC*K scalar*full-vreg FMAs — pure VPU hot path.
    for k in range(K):
        row = p_ref[k]                                        # (S, 128) full tiles
        for oc in range(OC):
            accs[oc] = accs[oc] + w_ref[oc * K + k] * row     # SMEM scalar * vreg

    for oc in range(OC):
        o_ref[oc] = accs[oc].astype(o_ref.dtype)              # unmasked full-tile vst


def conv2d_pallas(x, w, b):
    """Valid (no padding, stride 1) 2D convolution, NCHW / OIHW, like nn.Conv2d."""
    B, C, H, W = x.shape
    OC, IC, KH, KW = w.shape
    assert IC == C
    HO, WO = H - KH + 1, W - KW + 1
    K = C * KH * KW
    N = B * HO * WO

    tile = _SUBLANES * _LANES
    n_pad = ((N + tile - 1) // tile) * tile          # 392 -> 1024
    S = n_pad // _LANES                              # sublane-rows (multiple of 8)

    # im2col-lite: K pre-shifted, lane-dense rows. With allow_input_fusion this
    # slice/stack/pad producer is fused into the pallas_call's input DMA (no
    # separate HBM round trip for the slab).
    xf = x.astype(jnp.float32)
    cols = []
    for c in range(C):
        for kh in range(KH):
            for kw in range(KW):
                cols.append(xf[:, c, kh:kh + HO, kw:kw + WO].reshape(N))
    patches = jnp.stack(cols)                                    # (K, N)
    patches = jnp.pad(patches, ((0, 0), (0, n_pad - N)))         # (K, n_pad)
    patches = patches.reshape(K, S, _LANES)                      # full (8,128) tiles

    w_flat = w.reshape(OC * K).astype(jnp.float32)               # (OC*K,) scalars
    b_flat = b.astype(jnp.float32)                               # (OC,)   scalars

    out = pl.pallas_call(
        _conv_fma_kernel,
        out_shape=jax.ShapeDtypeStruct((OC, S, _LANES), jnp.float32),
        in_specs=[
            pl.BlockSpec(memory_space=pltpu.MemorySpace.SMEM),   # weights
            pl.BlockSpec(memory_space=pltpu.MemorySpace.SMEM),   # bias
            pl.BlockSpec(memory_space=pltpu.MemorySpace.VMEM),   # patches
        ],
        out_specs=pl.BlockSpec(memory_space=pltpu.MemorySpace.VMEM),
        compiler_params=pltpu.CompilerParams(
            # allow the im2col producer fusion to feed the patch operand directly
            allow_input_fusion=[False, False, True],
        ),
        cost_estimate=pl.CostEstimate(
            flops=2 * OC * K * n_pad,
            transcendentals=0,
            bytes_accessed=4 * (K * n_pad + OC * n_pad + OC * K + OC),
        ),
    )(w_flat, b_flat, patches)

    # (OC, n_pad) -> drop pad -> (B, OC, HO, WO): tiny XLA layout plumbing.
    out = out.reshape(OC, n_pad)[:, :N]
    return out.reshape(OC, B, HO, WO).transpose(1, 0, 2, 3).astype(x.dtype)


def init_params(key):
    """Deterministic synthetic parameters matching MyModule.__init__ shapes."""
    k1, k2, k3, k4 = jax.random.split(key, 4)
    return {
        "conv1_w": jax.random.normal(k1, (3, 1, 3, 3), jnp.float32) * 0.1,
        "conv1_b": jax.random.normal(k2, (3,), jnp.float32) * 0.1,
        "conv2_w": jax.random.normal(k3, (3, 2, 3, 3), jnp.float32) * 0.1,
        "conv2_b": jax.random.normal(k4, (3,), jnp.float32) * 0.1,
    }


@jax.jit
def my_module_forward(params, x):
    # Channel count is static under jit, so the PyTorch `if c == 1` branch is a
    # trace-time Python branch here (exactly matching forward semantics).
    b, c, h, w = x.shape
    if c == 1:
        return conv2d_pallas(x, params["conv1_w"], params["conv1_b"])
    return conv2d_pallas(x, params["conv2_w"], params["conv2_b"])


def _reference_conv(x, w, b):
    y = jax.lax.conv_general_dilated(
        x, w, window_strides=(1, 1), padding="VALID",
        dimension_numbers=("NCHW", "OIHW", "NCHW"))
    return y + b[None, :, None, None]


if __name__ == "__main__":
    root = jax.random.PRNGKey(0)
    kp, kx1, kx2 = jax.random.split(root, 3)
    params = init_params(kp)

    # branch 1: single-channel input -> conv1
    x1 = jax.random.normal(kx1, (2, 1, 16, 16), jnp.float32)
    # branch 2: two-channel input -> conv2
    x2 = jax.random.normal(kx2, (2, 2, 16, 16), jnp.float32)

    y1 = jax.block_until_ready(my_module_forward(params, x1))
    y2 = jax.block_until_ready(my_module_forward(params, x2))

    # sanity-check against XLA's convolution
    r1 = _reference_conv(x1, params["conv1_w"], params["conv1_b"])
    r2 = _reference_conv(x2, params["conv2_w"], params["conv2_b"])
    assert y1.shape == (2, 3, 14, 14) and y2.shape == (2, 3, 14, 14)
    assert jnp.allclose(y1, r1, atol=1e-4, rtol=1e-4)
    assert jnp.allclose(y2, r2, atol=1e-4, rtol=1e-4)

    print("KERNEL_OK")
</pallas_src>

<mosaic_0001>
module attributes {stable_mosaic.version = 11 : i64} {
  func.func @_conv_fma_kernel(%arg0: memref<27xf32, #tpu.memory_space<smem>>, %arg1: memref<3xf32, #tpu.memory_space<smem>>, %arg2: memref<9x8x128xf32, #tpu.memory_space<vmem>>, %arg3: memref<3x8x128xf32, #tpu.memory_space<vmem>>) attributes {dimension_semantics = [], scalar_prefetch = 0 : i64, scratch_operands = 0 : i64, tpu.core_type = #tpu.core_type<tc>} {
    %c0 = arith.constant 0 : index
    %0 = memref.load %arg1[%c0] : memref<3xf32, #tpu.memory_space<smem>>
    %1 = vector.broadcast %0 : f32 to vector<8x128xf32>
    %c1 = arith.constant 1 : index
    %2 = memref.load %arg1[%c1] : memref<3xf32, #tpu.memory_space<smem>>
    %3 = vector.broadcast %2 : f32 to vector<8x128xf32>
    %c2 = arith.constant 2 : index
    %4 = memref.load %arg1[%c2] : memref<3xf32, #tpu.memory_space<smem>>
    %5 = vector.broadcast %4 : f32 to vector<8x128xf32>
    %c0_0 = arith.constant 0 : index
    %c0_1 = arith.constant 0 : index
    %c0_2 = arith.constant 0 : index
    %6 = vector.load %arg2[%c0_0, %c0_1, %c0_2] : memref<9x8x128xf32, #tpu.memory_space<vmem>>, vector<1x8x128xf32>
    %7 = vector.shape_cast %6 : vector<1x8x128xf32> to vector<8x128xf32>
    %c0_3 = arith.constant 0 : index
    %8 = memref.load %arg0[%c0_3] : memref<27xf32, #tpu.memory_space<smem>>
    %9 = vector.broadcast %8 : f32 to vector<8x128xf32>
    %10 = arith.mulf %9, %7 : vector<8x128xf32>
    %11 = arith.addf %1, %10 : vector<8x128xf32>
    %c9 = arith.constant 9 : index
    %12 = memref.load %arg0[%c9] : memref<27xf32, #tpu.memory_space<smem>>
    %13 = vector.broadcast %12 : f32 to vector<8x128xf32>
    %14 = arith.mulf %13, %7 : vector<8x128xf32>
    %15 = arith.addf %3, %14 : vector<8x128xf32>
    %c18 = arith.constant 18 : index
    %16 = memref.load %arg0[%c18] : memref<27xf32, #tpu.memory_space<smem>>
    %17 = vector.broadcast %16 : f32 to vector<8x128xf32>
    %18 = arith.mulf %17, %7 : vector<8x128xf32>
    %19 = arith.addf %5, %18 : vector<8x128xf32>
    %c1_4 = arith.constant 1 : index
    %c0_5 = arith.constant 0 : index
    %c0_6 = arith.constant 0 : index
    %20 = vector.load %arg2[%c1_4, %c0_5, %c0_6] : memref<9x8x128xf32, #tpu.memory_space<vmem>>, vector<1x8x128xf32>
    %21 = vector.shape_cast %20 : vector<1x8x128xf32> to vector<8x128xf32>
    %c1_7 = arith.constant 1 : index
    %22 = memref.load %arg0[%c1_7] : memref<27xf32, #tpu.memory_space<smem>>
    %23 = vector.broadcast %22 : f32 to vector<8x128xf32>
    %24 = arith.mulf %23, %21 : vector<8x128xf32>
    %25 = arith.addf %11, %24 : vector<8x128xf32>
    %c10 = arith.constant 10 : index
    %26 = memref.load %arg0[%c10] : memref<27xf32, #tpu.memory_space<smem>>
    %27 = vector.broadcast %26 : f32 to vector<8x128xf32>
    %28 = arith.mulf %27, %21 : vector<8x128xf32>
    %29 = arith.addf %15, %28 : vector<8x128xf32>
    %c19 = arith.constant 19 : index
    %30 = memref.load %arg0[%c19] : memref<27xf32, #tpu.memory_space<smem>>
    %31 = vector.broadcast %30 : f32 to vector<8x128xf32>
    %32 = arith.mulf %31, %21 : vector<8x128xf32>
    %33 = arith.addf %19, %32 : vector<8x128xf32>
    %c2_8 = arith.constant 2 : index
    %c0_9 = arith.constant 0 : index
    %c0_10 = arith.constant 0 : index
    %34 = vector.load %arg2[%c2_8, %c0_9, %c0_10] : memref<9x8x128xf32, #tpu.memory_space<vmem>>, vector<1x8x128xf32>
    %35 = vector.shape_cast %34 : vector<1x8x128xf32> to vector<8x128xf32>
    %c2_11 = arith.constant 2 : index
    %36 = memref.load %arg0[%c2_11] : memref<27xf32, #tpu.memory_space<smem>>
    %37 = vector.broadcast %36 : f32 to vector<8x128xf32>
    %38 = arith.mulf %37, %35 : vector<8x128xf32>
    %39 = arith.addf %25, %38 : vector<8x128xf32>
    %c11 = arith.constant 11 : index
    %40 = memref.load %arg0[%c11] : memref<27xf32, #tpu.memory_space<smem>>
    %41 = vector.broadcast %40 : f32 to vector<8x128xf32>
    %42 = arith.mulf %41, %35 : vector<8x128xf32>
    %43 = arith.addf %29, %42 : vector<8x128xf32>
    %c20 = arith.constant 20 : index
    %44 = memref.load %arg0[%c20] : memref<27xf32, #tpu.memory_space<smem>>
    %45 = vector.broadcast %44 : f32 to vector<8x128xf32>
    %46 = arith.mulf %45, %35 : vector<8x128xf32>
    %47 = arith.addf %33, %46 : vector<8x128xf32>
    %c3 = arith.constant 3 : index
    %c0_12 = arith.constant 0 : index
    %c0_13 = arith.constant 0 : index
    %48 = vector.load %arg2[%c3, %c0_12, %c0_13] : memref<9x8x128xf32, #tpu.memory_space<vmem>>, vector<1x8x128xf32>
    %49 = vector.shape_cast %48 : vector<1x8x128xf32> to vector<8x128xf32>
    %c3_14 = arith.constant 3 : index
    %50 = memref.load %arg0[%c3_14] : memref<27xf32, #tpu.memory_space<smem>>
    %51 = vector.broadcast %50 : f32 to vector<8x128xf32>
    %52 = arith.mulf %51, %49 : vector<8x128xf32>
    %53 = arith.addf %39, %52 : vector<8x128xf32>
    %c12 = arith.constant 12 : index
    %54 = memref.load %arg0[%c12] : memref<27xf32, #tpu.memory_space<smem>>
    %55 = vector.broadcast %54 : f32 to vector<8x128xf32>
    %56 = arith.mulf %55, %49 : vector<8x128xf32>
    %57 = arith.addf %43, %56 : vector<8x128xf32>
    %c21 = arith.constant 21 : index
    %58 = memref.load %arg0[%c21] : memref<27xf32, #tpu.memory_space<smem>>
    %59 = vector.broadcast %58 : f32 to vector<8x128xf32>
    %60 = arith.mulf %59, %49 : vector<8x128xf32>
    %61 = arith.addf %47, %60 : vector<8x128xf32>
    %c4 = arith.constant 4 : index
    %c0_15 = arith.constant 0 : index
    %c0_16 = arith.constant 0 : index
    %62 = vector.load %arg2[%c4, %c0_15, %c0_16] : memref<9x8x128xf32, #tpu.memory_space<vmem>>, vector<1x8x128xf32>
    %63 = vector.shape_cast %62 : vector<1x8x128xf32> to vector<8x128xf32>
    %c4_17 = arith.constant 4 : index
    %64 = memref.load %arg0[%c4_17] : memref<27xf32, #tpu.memory_space<smem>>
    %65 = vector.broadcast %64 : f32 to vector<8x128xf32>
    %66 = arith.mulf %65, %63 : vector<8x128xf32>
    %67 = arith.addf %53, %66 : vector<8x128xf32>
    %c13 = arith.constant 13 : index
    %68 = memref.load %arg0[%c13] : memref<27xf32, #tpu.memory_space<smem>>
    %69 = vector.broadcast %68 : f32 to vector<8x128xf32>
    %70 = arith.mulf %69, %63 : vector<8x128xf32>
    %71 = arith.addf %57, %70 : vector<8x128xf32>
    %c22 = arith.constant 22 : index
    %72 = memref.load %arg0[%c22] : memref<27xf32, #tpu.memory_space<smem>>
    %73 = vector.broadcast %72 : f32 to vector<8x128xf32>
    %74 = arith.mulf %73, %63 : vector<8x128xf32>
    %75 = arith.addf %61, %74 : vector<8x128xf32>
    %c5 = arith.constant 5 : index
    %c0_18 = arith.constant 0 : index
    %c0_19 = arith.constant 0 : index
    %76 = vector.load %arg2[%c5, %c0_18, %c0_19] : memref<9x8x128xf32, #tpu.memory_space<vmem>>, vector<1x8x128xf32>
    %77 = vector.shape_cast %76 : vector<1x8x128xf32> to vector<8x128xf32>
    %c5_20 = arith.constant 5 : index
    %78 = memref.load %arg0[%c5_20] : memref<27xf32, #tpu.memory_space<smem>>
    %79 = vector.broadcast %78 : f32 to vector<8x128xf32>
    %80 = arith.mulf %79, %77 : vector<8x128xf32>
    %81 = arith.addf %67, %80 : vector<8x128xf32>
    %c14 = arith.constant 14 : index
    %82 = memref.load %arg0[%c14] : memref<27xf32, #tpu.memory_space<smem>>
    %83 = vector.broadcast %82 : f32 to vector<8x128xf32>
    %84 = arith.mulf %83, %77 : vector<8x128xf32>
    %85 = arith.addf %71, %84 : vector<8x128xf32>
    %c23 = arith.constant 23 : index
    %86 = memref.load %arg0[%c23] : memref<27xf32, #tpu.memory_space<smem>>
    %87 = vector.broadcast %86 : f32 to vector<8x128xf32>
    %88 = arith.mulf %87, %77 : vector<8x128xf32>
    %89 = arith.addf %75, %88 : vector<8x128xf32>
    %c6 = arith.constant 6 : index
    %c0_21 = arith.constant 0 : index
    %c0_22 = arith.constant 0 : index
    %90 = vector.load %arg2[%c6, %c0_21, %c0_22] : memref<9x8x128xf32, #tpu.memory_space<vmem>>, vector<1x8x128xf32>
    %91 = vector.shape_cast %90 : vector<1x8x128xf32> to vector<8x128xf32>
    %c6_23 = arith.constant 6 : index
    %92 = memref.load %arg0[%c6_23] : memref<27xf32, #tpu.memory_space<smem>>
    %93 = vector.broadcast %92 : f32 to vector<8x128xf32>
    %94 = arith.mulf %93, %91 : vector<8x128xf32>
    %95 = arith.addf %81, %94 : vector<8x128xf32>
    %c15 = arith.constant 15 : index
    %96 = memref.load %arg0[%c15] : memref<27xf32, #tpu.memory_space<smem>>
    %97 = vector.broadcast %96 : f32 to vector<8x128xf32>
    %98 = arith.mulf %97, %91 : vector<8x128xf32>
    %99 = arith.addf %85, %98 : vector<8x128xf32>
    %c24 = arith.constant 24 : index
    %100 = memref.load %arg0[%c24] : memref<27xf32, #tpu.memory_space<smem>>
    %101 = vector.broadcast %100 : f32 to vector<8x128xf32>
    %102 = arith.mulf %101, %91 : vector<8x128xf32>
    %103 = arith.addf %89, %102 : vector<8x128xf32>
    %c7 = arith.constant 7 : index
    %c0_24 = arith.constant 0 : index
    %c0_25 = arith.constant 0 : index
    %104 = vector.load %arg2[%c7, %c0_24, %c0_25] : memref<9x8x128xf32, #tpu.memory_space<vmem>>, vector<1x8x128xf32>
    %105 = vector.shape_cast %104 : vector<1x8x128xf32> to vector<8x128xf32>
    %c7_26 = arith.constant 7 : index
    %106 = memref.load %arg0[%c7_26] : memref<27xf32, #tpu.memory_space<smem>>
    %107 = vector.broadcast %106 : f32 to vector<8x128xf32>
    %108 = arith.mulf %107, %105 : vector<8x128xf32>
    %109 = arith.addf %95, %108 : vector<8x128xf32>
    %c16 = arith.constant 16 : index
    %110 = memref.load %arg0[%c16] : memref<27xf32, #tpu.memory_space<smem>>
    %111 = vector.broadcast %110 : f32 to vector<8x128xf32>
    %112 = arith.mulf %111, %105 : vector<8x128xf32>
    %113 = arith.addf %99, %112 : vector<8x128xf32>
    %c25 = arith.constant 25 : index
    %114 = memref.load %arg0[%c25] : memref<27xf32, #tpu.memory_space<smem>>
    %115 = vector.broadcast %114 : f32 to vector<8x128xf32>
    %116 = arith.mulf %115, %105 : vector<8x128xf32>
    %117 = arith.addf %103, %116 : vector<8x128xf32>
    %c8 = arith.constant 8 : index
    %c0_27 = arith.constant 0 : index
    %c0_28 = arith.constant 0 : index
    %118 = vector.load %arg2[%c8, %c0_27, %c0_28] : memref<9x8x128xf32, #tpu.memory_space<vmem>>, vector<1x8x128xf32>
    %119 = vector.shape_cast %118 : vector<1x8x128xf32> to vector<8x128xf32>
    %c8_29 = arith.constant 8 : index
    %120 = memref.load %arg0[%c8_29] : memref<27xf32, #tpu.memory_space<smem>>
    %121 = vector.broadcast %120 : f32 to vector<8x128xf32>
    %122 = arith.mulf %121, %119 : vector<8x128xf32>
    %123 = arith.addf %109, %122 : vector<8x128xf32>
    %c17 = arith.constant 17 : index
    %124 = memref.load %arg0[%c17] : memref<27xf32, #tpu.memory_space<smem>>
    %125 = vector.broadcast %124 : f32 to vector<8x128xf32>
    %126 = arith.mulf %125, %119 : vector<8x128xf32>
    %127 = arith.addf %113, %126 : vector<8x128xf32>
    %c26 = arith.constant 26 : index
    %128 = memref.load %arg0[%c26] : memref<27xf32, #tpu.memory_space<smem>>
    %129 = vector.broadcast %128 : f32 to vector<8x128xf32>
    %130 = arith.mulf %129, %119 : vector<8x128xf32>
    %131 = arith.addf %117, %130 : vector<8x128xf32>
    %c0_30 = arith.constant 0 : index
    %c0_31 = arith.constant 0 : index
    %c0_32 = arith.constant 0 : index
    %132 = vector.load %arg3[%c0_30, %c0_31, %c0_32] : memref<3x8x128xf32, #tpu.memory_space<vmem>>, vector<1x8x128xf32>
    %133 = vector.shape_cast %132 : vector<1x8x128xf32> to vector<8x128xf32>
    %134 = vector.shape_cast %123 : vector<8x128xf32> to vector<1x8x128xf32>
    tpu.vector_store %arg3[%c0_30, %c0_31, %c0_32], %134 {strides = array<i32>} : memref<3x8x128xf32, #tpu.memory_space<vmem>>, vector<1x8x128xf32>,
    %c1_33 = arith.constant 1 : index
    %c0_34 = arith.constant 0 : index
    %c0_35 = arith.constant 0 : index
    %135 = vector.load %arg3[%c1_33, %c0_34, %c0_35] : memref<3x8x128xf32, #tpu.memory_space<vmem>>, vector<1x8x128xf32>
    %136 = vector.shape_cast %135 : vector<1x8x128xf32> to vector<8x128xf32>
    %137 = vector.shape_cast %127 : vector<8x128xf32> to vector<1x8x128xf32>
    tpu.vector_store %arg3[%c1_33, %c0_34, %c0_35], %137 {strides = array<i32>} : memref<3x8x128xf32, #tpu.memory_space<vmem>>, vector<1x8x128xf32>,
    %c2_36 = arith.constant 2 : index
    %c0_37 = arith.constant 0 : index
    %c0_38 = arith.constant 0 : index
    %138 = vector.load %arg3[%c2_36, %c0_37, %c0_38] : memref<3x8x128xf32, #tpu.memory_space<vmem>>, vector<1x8x128xf32>
    %139 = vector.shape_cast %138 : vector<1x8x128xf32> to vector<8x128xf32>
    %140 = vector.shape_cast %131 : vector<8x128xf32> to vector<1x8x128xf32>
    tpu.vector_store %arg3[%c2_36, %c0_37, %c0_38], %140 {strides = array<i32>} : memref<3x8x128xf32, #tpu.memory_space<vmem>>, vector<1x8x128xf32>,
    return
  }
}

</mosaic_0001>

<bundles_post_ra>
// kernel: squeeze.10
= control target key start
LH: loop header
LB: loop body
LE: loop exit
PB: predicated region body
PF: predicated region fallthrough
CT: control target
= control target key end

     0   :  { %vm9_vm0 = vcmask 15360   ;;  %vm36_vm1 = vcmask 48128   ;;  %s296_s14 = smov 126   ;;  %vm22_vm2 = vcmask 31744   ;;  %s297_s19 = smov 122   ;;  %vm3_vm3 = vcmask 113664   ;;  %s438_s0 = inlined_call_operand.vmem [shape: f32[2,1,14,14], index: 0, kind: input, shape index: {}]   ;;  %s439_s1 = inlined_call_operand.vmem [shape: f32[1,392], index: 1, kind: output, shape index: {}]  }
   0x1   :  { %v236_v0 = vld [vmem:[%s438_s0 + $0x9] sm:$0x1]   ;;  %v240_v3 = vld [vmem:[%s438_s0 + $0x1d] sm:$0x1]   ;;  %v238_v6 = vld [vmem:[%s438_s0 + $0x14] sm:$0x1]  }
   0x2   :  { %v237_v1 = vld [vmem:[%s438_s0 + $0x9] sm:$0x1]   ;;  %v241_v4 = vld [vmem:[%s438_s0 + $0x1d] sm:$0x1]   ;;  %v239_v7 = vld [vmem:[%s438_s0 + $0x14] sm:$0x1]  }
   0x3   :  { %v10_v2 = vsel %vm9_vm0, %v237_v1, %v236_v0  ;;  %v37_v5 = vsel %vm36_vm1, %v241_v4, %v240_v3  ;;  %v23_v8 = vsel %vm22_vm2, %v239_v7, %v238_v6  ;;  %v242_v9 = vld [vmem:[%s438_s0 + $0x8] sm:$0x1]   ;;  %s298_s22 = smov 124   ;;  %s299_s23 = smov 112   ;;  %v243_v10 = vld [vmem:[%s438_s0 + $0x13] sm:$0x1]  }
   0x4   :  { %11 = vrot.lane.b32.xlu0 %v10_v2, %s296_s14  ;;  %38 = vrot.lane.b32.xlu1 %v37_v5, %s297_s19  ;;  %v244_v11 = vld [vmem:[%s438_s0 + $0x1c] sm:$0x1]   ;;  %s300_s28 = smov 110   ;;  %s301_s29 = smov 108   ;;  %v245_v12 = vld [vmem:[%s438_s0 + $0x7] sm:$0x1]  }
   0x5   :  { %v246_v13 = vld [vmem:[%s438_s0 + $0x12] sm:$0x1]   ;;  %s302_s5 = smov 98   ;;  %s303_s6 = smov 96   ;;  %v247_v14 = vld [vmem:[%s438_s0 + $0x1b] sm:$0x1]  }
   0x6   :  { %v2_v15 = vld [vmem:[%s438_s0] sm:$0x1]   ;;  %v248_v16 = vld [vmem:[%s438_s0 + $0x6] sm:$0x1]   ;;  %s304_s13 = smov 94   ;;  %s305_s14 = smov 84  }
   0x7   :  { %4 = vst.msk [vmem:[#allocation0] sm:$0x1] %vm3_vm3, %v2_v15   ;;  %v249_v17 = vld [vmem:[%s438_s0 + $0x11] sm:$0x1]   ;;  %v250_v18 = vld [vmem:[%s438_s0 + $0x1a] sm:$0x1]  }
   0x8   :  { %24 = vrot.lane.b32.xlu0 %v23_v8, %s298_s22  ;;  %48 = vrot.lane.b32.xlu1 %v242_v9, %s299_s23  ;;  %s306_s19 = smov 82   ;;  %s307_s20 = smov 80   ;;  %v251_v19 = vld [vmem:[%s438_s0 + $0x5] sm:$0x1]   ;;  %v252_v20 = vld [vmem:[%s438_s0 + $0x10] sm:$0x1]  }
   0x9   :  { %s308_s25 = smov 70   ;;  %s309_s26 = smov 68   ;;  %v253_v21 = vld [vmem:[%s438_s0 + $0x19] sm:$0x1]   ;;  %v254_v22 = vld [vmem:[%s438_s0 + $0x4] sm:$0x1]  }
   0xa   :  { %s310_s2 = smov 66   ;;  %s311_s3 = smov 56   ;;  %v255_v23 = vld [vmem:[%s438_s0 + $0xd] sm:$0x1]   ;;  %v256_v24 = vld [vmem:[%s438_s0 + $0x18] sm:$0x1]  }
   0xb   :  { %s312_s8 = smov 54   ;;  %s313_s9 = smov 52   ;;  %v257_v25 = vld [vmem:[%s438_s0 + $0x3] sm:$0x1]   ;;  %v258_v26 = vld [vmem:[%s438_s0 + $0xc] sm:$0x1]  }
   0xc   :  { %54 = vrot.lane.b32.xlu0 %v243_v10, %s300_s28  ;;  %61 = vrot.lane.b32.xlu1 %v244_v11, %s301_s29  ;;  %s315_s15 = smov 40   ;;  %v259_v27 = vld [vmem:[%s438_s0 + $0x17] sm:$0x1]   ;;  %v260_v28 = vld [vmem:[%s438_s0 + $0x2] sm:$0x1]   ;;  %s317_s21 = smov 28  }
   0xd   :  { %v261_v29 = vld [vmem:[%s438_s0 + $0xb] sm:$0x1]   ;;  %v262_v30 = vld [vmem:[%s438_s0 + $0x16] sm:$0x1]   ;;  %s319_s27 = smov 24   ;;  %s321_s4 = smov 12  }
   0xe   :  { %v263_v31 = vld [vmem:[%s438_s0 + $0x1] sm:$0x1]   ;;  %v264_v32 = vld [vmem:[%s438_s0 + $0xa] sm:$0x1]   ;;  %v265_v33 = vld [vmem:[%s438_s0 + $0x15] sm:$0x1]  }
   0xf   :  { %s322_s0 = smov 10   ;;  %vm13_vm4 = vcmask 97280   ;;  %vm16_vm5 = vcmask 1048560   ;;  %vm40_vm6 = vcmask 64512   ;;  %vm26_vm7 = vcmask 80896  }
  0x10   :  { %68 = vrot.lane.b32.xlu0 %v245_v12, %s302_s5  ;;  %74 = vrot.lane.b32.xlu1 %v246_v13, %s303_s6  ;;  %vm29_vm8 = vcmask 1048544   ;;  %vm43_vm9 = vcmask 1048528   ;;  %vm50_vm10 = vcmask 1032064   ;;  %vm56_vm11 = vcmask 1015664  }
  0x11   :  { %vm63_vm12 = vcmask 999264   ;;  %vm70_vm13 = vcmask 917264   ;;  %vm76_vm14 = vcmask 900864   ;;  %vm83_vm15 = vcmask 884464  }
  0x12   :  { %vm90_vm0 = vcmask 802464   ;;  %vm96_vm1 = vcmask 786064   ;;  %vm103_vm2 = vcmask 769664   ;;  %vm110_vm3 = vcmask 687664  }
  0x14   :  { %81 = vrot.lane.b32.xlu0 %v247_v14, %s304_s13  ;;  %88 = vrot.lane.b32.xlu1 %v248_v16, %s305_s14  ;;  %s314_s14 = smov 42  }
  0x18   :  { %94 = vrot.lane.b32.xlu0 %v249_v17, %s306_s19  ;;  %101 = vrot.lane.b32.xlu1 %v250_v18, %s307_s20  ;;  %s316_s20 = smov 38  }
  0x1c   :  { %108 = vrot.lane.b32.xlu0 %v251_v19, %s308_s25  ;;  %114 = vrot.lane.b32.xlu1 %v252_v20, %s309_s26  ;;  %s318_s26 = smov 26  }
  0x20   :  { %121 = vrot.lane.b32.xlu0 %v253_v21, %s310_s2  ;;  %128 = vrot.lane.b32.xlu1 %v254_v22, %s311_s3  ;;  %s320_s3 = smov 14  }
  0x24   :  { %134 = vrot.lane.b32.xlu0 %v255_v23, %s312_s8  ;;  %141 = vrot.lane.b32.xlu1 %v256_v24, %s313_s9 }
  0x28   :  { %148 = vrot.lane.b32.xlu0 %v257_v25, %s314_s14  ;;  %154 = vrot.lane.b32.xlu1 %v258_v26, %s315_s15 }
  0x2c   :  { %161 = vrot.lane.b32.xlu0 %v259_v27, %s316_s20  ;;  %168 = vrot.lane.b32.xlu1 %v260_v28, %s317_s21 }
  0x30   :  { %174 = vrot.lane.b32.xlu0 %v261_v29, %s318_s26  ;;  %181 = vrot.lane.b32.xlu1 %v262_v30, %s319_s27 }
  0x34   :  { %188 = vrot.lane.b32.xlu0 %v263_v31, %s320_s3  ;;  %194 = vrot.lane.b32.xlu1 %v264_v32, %s321_s4 }
  0x38   :  { %201 = vrot.lane.b32.xlu0 %v265_v33, %s322_s0 }
  0x76   :  { %v12_v34 = vpop.permute.xlu0 %11   ;;  %v39_v35 = vpop.permute.xlu1 %38  }
  0x77   :  { %15 = vst.msk [vmem:[#allocation0 + $0x8] sm:$0x1] %vm13_vm4, %v12_v34   ;;  %vm116_vm4 = vcmask 671264  }
  0x78   :  { %17 = vst.msk [vmem:[#allocation0] sm:$0x1] %vm16_vm5, %v12_v34   ;;  %vm123_vm5 = vcmask 654864  }
  0x79   :  { %42 = vst.msk [vmem:[#allocation0 + $0x18] sm:$0x1] %vm40_vm6, %v39_v35   ;;  %vm130_vm6 = vcmask 572864  }
  0x7a   :  { %v25_v36 = vpop.permute.xlu0 %24   ;;  %v49_v37 = vpop.permute.xlu1 %48  }
  0x7b   :  { %28 = vst.msk [vmem:[#allocation0 + $0x10] sm:$0x1] %vm26_vm7, %v25_v36   ;;  %vm136_vm7 = vcmask 556464  }
  0x7c   :  { %31 = vst.msk [vmem:[#allocation0 + $0x8] sm:$0x1] %vm29_vm8, %v25_v36   ;;  %vm143_vm8 = vcmask 540064  }
  0x7d   :  { %45 = vst.msk [vmem:[#allocation0 + $0x10] sm:$0x1] %vm43_vm9, %v39_v35   ;;  %vm150_vm9 = vcmask 458064  }
  0x7e   :  { %51 = vst.msk [vmem:[#allocation0] sm:$0x1] %vm50_vm10, %v49_v37   ;;  %v55_v38 = vpop.permute.xlu0 %54   ;;  %v62_v40 = vpop.permute.xlu1 %61   ;;  %vm156_vm10 = vcmask 441664  }
  0x7f   :  { %58 = vst.msk [vmem:[#allocation0 + $0x8] sm:$0x1] %vm56_vm11, %v55_v38   ;;  %vm163_vm11 = vcmask 425264  }
  0x80   :  { %v228_v39 = vld [vmem:[#allocation0 + $0x18] sm:$0x1]  ;;  %65 = vst.msk [vmem:[#allocation0 + $0x10] sm:$0x1] %vm63_vm12, %v62_v40   ;;  %vm170_vm12 = vcmask 343264  }
  0x81   :  { %268 = vst [vmem:[%s439_s1 + $0x3] sm:$0x1] %v228_v39 }
  0x82   :  { %v69_v41 = vpop.permute.xlu0 %68   ;;  %v75_v42 = vpop.permute.xlu1 %74  }
  0x83   :  { %71 = vst.msk [vmem:[#allocation0] sm:$0x1] %vm70_vm13, %v69_v41   ;;  %vm176_vm13 = vcmask 326864  }
  0x84   :  { %78 = vst.msk [vmem:[#allocation0 + $0x8] sm:$0x1] %vm76_vm14, %v75_v42   ;;  %vm183_vm14 = vcmask 310464  }
  0x86   :  { %v82_v43 = vpop.permute.xlu0 %81   ;;  %v89_v44 = vpop.permute.xlu1 %88  }
  0x87   :  { %85 = vst.msk [vmem:[#allocation0 + $0x10] sm:$0x1] %vm83_vm15, %v82_v43   ;;  %vm190_vm15 = vcmask 228464  }
  0x88   :  { %91 = vst.msk [vmem:[#allocation0] sm:$0x1] %vm90_vm0, %v89_v44   ;;  %vm196_vm0 = vcmask 212064  }
  0x8a   :  { %v95_v45 = vpop.permute.xlu0 %94   ;;  %v102_v46 = vpop.permute.xlu1 %101  }
  0x8b   :  { %98 = vst.msk [vmem:[#allocation0 + $0x8] sm:$0x1] %vm96_vm1, %v95_v45   ;;  %vm203_vm1 = vcmask 195664  }
  0x8c   :  { %105 = vst.msk [vmem:[#allocation0 + $0x10] sm:$0x1] %vm103_vm2, %v102_v46  }
  0x8e   :  { %v109_v47 = vpop.permute.xlu0 %108   ;;  %v115_v48 = vpop.permute.xlu1 %114  }
  0x8f   :  { %111 = vst.msk [vmem:[#allocation0] sm:$0x1] %vm110_vm3, %v109_v47  }
  0x90   :  { %118 = vst.msk [vmem:[#allocation0 + $0x8] sm:$0x1] %vm116_vm4, %v115_v48  }
  0x92   :  { %v122_v49 = vpop.permute.xlu0 %121   ;;  %v129_v50 = vpop.permute.xlu1 %128  }
  0x93   :  { %125 = vst.msk [vmem:[#allocation0 + $0x10] sm:$0x1] %vm123_vm5, %v122_v49  }
  0x94   :  { %131 = vst.msk [vmem:[#allocation0] sm:$0x1] %vm130_vm6, %v129_v50  }
  0x96   :  { %v135_v51 = vpop.permute.xlu0 %134   ;;  %v142_v52 = vpop.permute.xlu1 %141  }
  0x97   :  { %138 = vst.msk [vmem:[#allocation0 + $0x8] sm:$0x1] %vm136_vm7, %v135_v51  }
  0x98   :  { %145 = vst.msk [vmem:[#allocation0 + $0x10] sm:$0x1] %vm143_vm8, %v142_v52  }
  0x9a   :  { %v149_v53 = vpop.permute.xlu0 %148   ;;  %v155_v54 = vpop.permute.xlu1 %154  }
  0x9b   :  { %151 = vst.msk [vmem:[#allocation0] sm:$0x1] %vm150_vm9, %v149_v53  }
  0x9c   :  { %158 = vst.msk [vmem:[#allocation0 + $0x8] sm:$0x1] %vm156_vm10, %v155_v54  }
  0x9e   :  { %v162_v55 = vpop.permute.xlu0 %161   ;;  %v169_v56 = vpop.permute.xlu1 %168  }
  0x9f   :  { %165 = vst.msk [vmem:[#allocation0 + $0x10] sm:$0x1] %vm163_vm11, %v162_v55  }
  0xa0   :  { %171 = vst.msk [vmem:[#allocation0] sm:$0x1] %vm170_vm12, %v169_v56  }
  0xa2   :  { %v175_v57 = vpop.permute.xlu0 %174   ;;  %v182_v58 = vpop.permute.xlu1 %181  }
  0xa3   :  { %178 = vst.msk [vmem:[#allocation0 + $0x8] sm:$0x1] %vm176_vm13, %v175_v57  }
  0xa4   :  { %185 = vst.msk [vmem:[#allocation0 + $0x10] sm:$0x1] %vm183_vm14, %v182_v58  }
  0xa6   :  { %v189_v59 = vpop.permute.xlu0 %188   ;;  %v195_v60 = vpop.permute.xlu1 %194  }
  0xa7   :  { %191 = vst.msk [vmem:[#allocation0] sm:$0x1] %vm190_vm15, %v189_v59  }
  0xa8   :  { %198 = vst.msk [vmem:[#allocation0 + $0x8] sm:$0x1] %vm196_vm0, %v195_v60  }
  0xaa   :  { %v202_v61 = vpop.permute.xlu0 %201  }
  0xab   :  { %205 = vst.msk [vmem:[#allocation0 + $0x10] sm:$0x1] %vm203_vm1, %v202_v61  }
  0xae   :  { %v210_v62 = vld [vmem:[#allocation0] sm:$0x1] }
  0xaf   :  { %213 = vst [vmem:[%s439_s1] sm:$0x1] %v210_v62  ;;  %v215_v63 = vld [vmem:[#allocation0 + $0x8] sm:$0x1] }
  0xb0   :  { %266 = vst [vmem:[%s439_s1 + $0x1] sm:$0x1] %v215_v63 }
  0xb2   :  { %v221_v0 = vld [vmem:[#allocation0 + $0x10] sm:$0x1] }
  0xb3   :  { %267 = vst [vmem:[%s439_s1 + $0x2] sm:$0x1] %v221_v0 }

// kernel: my_module_forward.2
= control target key start
LH: loop header
LB: loop body
LE: loop exit
PB: predicated region body
PF: predicated region fallthrough
CT: control target
= control target key end

     0   :  { %8 = vsyncpa [#allocation8], 0  ;;  %s365_s0 = inlined_call_operand.vmem [shape: f32[27], index: 0, kind: input, shape index: {}]   ;;  %s366_s1 = inlined_call_operand.vmem [shape: f32[3], index: 1, kind: input, shape index: {}]   ;;  %s367_s2 = inlined_call_operand.vmem [shape: f32[16,8,128], index: 2, kind: input, shape index: {}]   ;;  %s368_s3 = inlined_call_operand.vmem [shape: f32[3,8,128], index: 3, kind: output, shape index: {}]  }
   0x1   :  { %s16_s14 = sshll.u32 %s365_s0, 4  ;;  %s17_s14 = int_to_ptr.vmem [resolvable:$true] %s16_s14 }
   0x2   :  { %9 = vsyncpa [#allocation10], 0  ;;  %s26_s17 = sshll.u32 %s366_s1, 4  ;;  %s273_s18 = scalar_lea.vmem %s17_s14, 16  ;;  %s27_s17 = int_to_ptr.vmem [resolvable:$true] %s26_s17 }
   0x3   :  { %p274_p0 = scmp.ne.s32.totalorder %s17_s14, %s273_s18  ;;  %p278_p1 = scmp.lt.s32.totalorder %s17_s14, %s17_s14 }
   0x4   :  { %p279_p2 = scmp.lt.s32.totalorder %s273_s18, %s273_s18 }
   0x6   :  { %p280_p3 = por %p279_p2, %p278_p1 }
   0x8   :  { %p281_p4 = pnand %p280_p3, %p274_p0 }
   0xa   :  { %284 = shalt.err (!%p281_p4)
}
   0xb   :  { %s301_s19 = smov [#allocation7]   ;;  %s285_s20 = scalar_lea.vmem %s27_s17, 16 }
   0xc   :  { %19 = dma.vmem_to_smem %s17_s14, 16, %s301_s19, [#allocation8]  }
   0xd   :  { %p286_p5 = scmp.ne.s32.totalorder %s27_s17, %s285_s20  ;;  %p290_p6 = scmp.lt.s32.totalorder %s27_s17, %s27_s17 }
   0xe   :  { %p291_p7 = scmp.lt.s32.totalorder %s285_s20, %s285_s20 }
  0x10   :  { %p292_p8 = por %p291_p7, %p290_p6 }
  0x12   :  { %p293_p9 = pnand %p292_p8, %p286_p5 }
  0x14   :  { %296 = shalt.err (!%p293_p9)
}
  0x15   :  { %s302_s0 = smov [#allocation9]  }
  0x16   :  { %29 = dma.vmem_to_smem %s27_s17, 16, %s302_s0, [#allocation10]  }
  0x17   :  { %297 = dma.done.wait [#allocation8], 16  }
  0x18   :  { %298 = vsyncadd [#allocation8], 4294967280 }
  0x19   :  { %299 = dma.done.wait [#allocation10], 16  }
  0x1a   :  { %300 = vsyncadd [#allocation10], 4294967280 }
  0x1b   :  { %38 = sfence }
  0x1c   :  { %s91_s1 = sld [smem:[#allocation9]]  ;;  %v39_v0 = vld [vmem:[%s367_s2] sm:$0xff]  ;;  %v233_v3 = vld [vmem:[%s367_s2 + $0x8] sm:$0xff]  ;;  %v234_v13 = vld [vmem:[%s367_s2 + $0x10] sm:$0xff] }
  0x1d   :  { %s241_s21 = sld [smem:[#allocation9 + $0x1]]  ;;  %v235_v23 = vld [vmem:[%s367_s2 + $0x18] sm:$0xff]  ;;  %v236_v33 = vld [vmem:[%s367_s2 + $0x20] sm:$0xff]  ;;  %v237_v43 = vld [vmem:[%s367_s2 + $0x28] sm:$0xff] }
  0x1e   :  { %s242_s22 = sld [smem:[#allocation9 + $0x2]]  ;;  %v238_v53 = vld [vmem:[%s367_s2 + $0x30] sm:$0xff]  ;;  %v239_v63 = vld [vmem:[%s367_s2 + $0x38] sm:$0xff] }
  0x1f   :  { %s98_s23 = sld [smem:[#allocation7]] }
  0x20   :  { %s243_s24 = sld [smem:[#allocation7 + $0x9]] }
  0x21   :  { %s244_s25 = sld [smem:[#allocation7 + $0x12]] }
  0x22   :  { %s245_s26 = sld [smem:[#allocation7 + $0x1]]  ;;  %v92_v1 = vstv %s91_s1 }
  0x23   :  { %s246_s29 = sld [smem:[#allocation7 + $0xa]]  ;;  %v94_v4 = vstv %s241_s21 }
  0x24   :  { %s247_s30 = sld [smem:[#allocation7 + $0x13]]  ;;  %v96_v7 = vstv %s242_s22 }
  0x25   :  { %v99_v2 = vstv %s98_s23  ;;  %s248_s4 = sld [smem:[#allocation7 + $0x2]] }
  0x26   :  { %v100_v5 = vmul.f32 %v99_v2, %v39_v0  ;;  %v103_v6 = vstv %s243_s24  ;;  %s249_s7 = sld [smem:[#allocation7 + $0xb]] }
  0x27   :  { %v104_v8 = vmul.f32 %v103_v6, %v39_v0  ;;  %v107_v9 = vstv %s244_s25  ;;  %s250_s8 = sld [smem:[#allocation7 + $0x14]] }
  0x28   :  { %v101_v10 = vadd.f32 %v100_v5, %v92_v1  ;;  %v108_v11 = vmul.f32 %v107_v9, %v39_v0  ;;  %v113_v12 = vstv %s245_s26  ;;  %s251_s9 = sld [smem:[#allocation7 + $0x3]]  ;;  %v240_v9 = vld [vmem:[%s367_s2 + $0x40] sm:$0xff] }
  0x29   :  { %v105_v14 = vadd.f32 %v104_v8, %v94_v4  ;;  %v114_v15 = vmul.f32 %v233_v3, %v113_v12  ;;  %v117_v16 = vstv %s246_s29  ;;  %s252_s12 = sld [smem:[#allocation7 + $0xc]] }
  0x2a   :  { %v109_v17 = vadd.f32 %v108_v11, %v96_v7  ;;  %v118_v18 = vmul.f32 %v233_v3, %v117_v16  ;;  %v121_v19 = vstv %s247_s30  ;;  %s253_s13 = sld [smem:[#allocation7 + $0x15]] }
  0x2b   :  { %v115_v20 = vadd.f32 %v114_v15, %v101_v10  ;;  %v122_v21 = vmul.f32 %v233_v3, %v121_v19  ;;  %v127_v22 = vstv %s248_s4  ;;  %s254_s14 = sld [smem:[#allocation7 + $0x4]] }
  0x2c   :  { %v119_v24 = vadd.f32 %v118_v18, %v105_v14  ;;  %v128_v25 = vmul.f32 %v234_v13, %v127_v22  ;;  %v131_v26 = vstv %s249_s7  ;;  %s255_s17 = sld [smem:[#allocation7 + $0xd]] }
  0x2d   :  { %v123_v27 = vadd.f32 %v122_v21, %v109_v17  ;;  %v132_v28 = vmul.f32 %v234_v13, %v131_v26  ;;  %v135_v29 = vstv %s250_s8  ;;  %s256_s18 = sld [smem:[#allocation7 + $0x16]] }
  0x2e   :  { %v129_v30 = vadd.f32 %v128_v25, %v115_v20  ;;  %v136_v31 = vmul.f32 %v234_v13, %v135_v29  ;;  %v141_v32 = vstv %s251_s9  ;;  %s257_s19 = sld [smem:[#allocation7 + $0x5]] }
  0x2f   :  { %v133_v34 = vadd.f32 %v132_v28, %v119_v24  ;;  %v142_v35 = vmul.f32 %v235_v23, %v141_v32  ;;  %v145_v36 = vstv %s252_s12  ;;  %s258_s1 = sld [smem:[#allocation7 + $0xe]] }
  0x30   :  { %v137_v37 = vadd.f32 %v136_v31, %v123_v27  ;;  %v146_v38 = vmul.f32 %v235_v23, %v145_v36  ;;  %v149_v39 = vstv %s253_s13  ;;  %s259_s21 = sld [smem:[#allocation7 + $0x17]] }
  0x31   :  { %v143_v40 = vadd.f32 %v142_v35, %v129_v30  ;;  %v150_v41 = vmul.f32 %v235_v23, %v149_v39  ;;  %v155_v42 = vstv %s254_s14  ;;  %s260_s22 = sld [smem:[#allocation7 + $0x6]] }
  0x32   :  { %v147_v44 = vadd.f32 %v146_v38, %v133_v34  ;;  %v156_v45 = vmul.f32 %v236_v33, %v155_v42  ;;  %v159_v46 = vstv %s255_s17  ;;  %s261_s25 = sld [smem:[#allocation7 + $0xf]] }
  0x33   :  { %v151_v47 = vadd.f32 %v150_v41, %v137_v37  ;;  %v160_v48 = vmul.f32 %v236_v33, %v159_v46  ;;  %v163_v49 = vstv %s256_s18  ;;  %s262_s26 = sld [smem:[#allocation7 + $0x18]] }
  0x34   :  { %v157_v50 = vadd.f32 %v156_v45, %v143_v40  ;;  %v164_v51 = vmul.f32 %v236_v33, %v163_v49  ;;  %v169_v52 = vstv %s257_s19  ;;  %s263_s27 = sld [smem:[#allocation7 + $0x7]] }
  0x35   :  { %v161_v54 = vadd.f32 %v160_v48, %v147_v44  ;;  %v170_v55 = vmul.f32 %v237_v43, %v169_v52  ;;  %v173_v56 = vstv %s258_s1  ;;  %s264_s30 = sld [smem:[#allocation7 + $0x10]] }
  0x36   :  { %v165_v57 = vadd.f32 %v164_v51, %v151_v47  ;;  %v174_v58 = vmul.f32 %v237_v43, %v173_v56  ;;  %v177_v59 = vstv %s259_s21  ;;  %s265_s4 = sld [smem:[#allocation7 + $0x19]] }
  0x37   :  { %v171_v60 = vadd.f32 %v170_v55, %v157_v50  ;;  %v178_v61 = vmul.f32 %v237_v43, %v177_v59  ;;  %v183_v62 = vstv %s260_s22  ;;  %s266_s5 = sld [smem:[#allocation7 + $0x8]] }
  0x38   :  { %v175_v0 = vadd.f32 %v174_v58, %v161_v54  ;;  %v184_v1 = vmul.f32 %v238_v53, %v183_v62  ;;  %v187_v2 = vstv %s261_s25  ;;  %s267_s8 = sld [smem:[#allocation7 + $0x11]] }
  0x39   :  { %v179_v3 = vadd.f32 %v178_v61, %v165_v57  ;;  %v188_v4 = vmul.f32 %v238_v53, %v187_v2  ;;  %v191_v5 = vstv %s262_s26  ;;  %s268_s9 = sld [smem:[#allocation7 + $0x1a]] }
  0x3a   :  { %v185_v6 = vadd.f32 %v184_v1, %v171_v60  ;;  %v192_v7 = vmul.f32 %v238_v53, %v191_v5  ;;  %v197_v8 = vstv %s263_s27 }
  0x3b   :  { %v189_v10 = vadd.f32 %v188_v4, %v175_v0  ;;  %v198_v11 = vmul.f32 %v239_v63, %v197_v8  ;;  %v201_v12 = vstv %s264_s30 }
  0x3c   :  { %v193_v13 = vadd.f32 %v192_v7, %v179_v3  ;;  %v202_v14 = vmul.f32 %v239_v63, %v201_v12  ;;  %v205_v15 = vstv %s265_s4 }
  0x3d   :  { %v199_v16 = vadd.f32 %v198_v11, %v185_v6  ;;  %v206_v17 = vmul.f32 %v239_v63, %v205_v15  ;;  %v211_v18 = vstv %s266_s5 }
  0x3e   :  { %v203_v19 = vadd.f32 %v202_v14, %v189_v10  ;;  %v212_v20 = vmul.f32 %v240_v9, %v211_v18  ;;  %v215_v21 = vstv %s267_s8 }
  0x3f   :  { %v207_v22 = vadd.f32 %v206_v17, %v193_v13  ;;  %v216_v23 = vmul.f32 %v240_v9, %v215_v21  ;;  %v219_v24 = vstv %s268_s9 }
  0x40   :  { %v213_v25 = vadd.f32 %v212_v20, %v199_v16  ;;  %v220_v26 = vmul.f32 %v240_v9, %v219_v24 }
  0x41   :  { %v217_v27 = vadd.f32 %v216_v23, %v203_v19 }
  0x42   :  { %v221_v28 = vadd.f32 %v220_v26, %v207_v22  ;;  %222 = vst [vmem:[%s368_s3] sm:$0xff] %v213_v25 }
  0x43   :  { %269 = vst [vmem:[%s368_s3 + $0x8] sm:$0xff] %v217_v27 }
  0x44   :  { %270 = vst [vmem:[%s368_s3 + $0x10] sm:$0xff] %v221_v28 }
  0x45   :  { %231 = vsyncpa [#allocation8], 1 }
  0x46   :  { %232 = vsyncpa [#allocation10], 1 }

</bundles_post_ra>
